<compile_context>
chip_gen: v5e
topology: v5e:2x2
jax: 0.10.0
libtpu: 0.0.40
codegen_flags: <defaults>
</compile_context>

<pallas_src>
import numpy as np
import jax
import jax.numpy as jnp
from jax.experimental import pallas as pl
from jax.experimental.pallas import tpu as pltpu

# Sizes implied by the module
D_IN = 2
H1 = 99
H2 = 198                      # length entering ConvTranspose1d #1
K1, S1 = 4, 1                 # first transposed conv
L3 = (H2 - 1) * S1 + K1       # 201
K2, S2 = 22, 3                # second transposed conv
L_OUT = (L3 - 1) * S2 + K2    # 622

# Lane-aligned (128-multiple) padded sizes
H1P = 128                     # 99  -> 128
H2P = 256                     # 198 -> 256
L3P = 256                     # 201 -> 256
LOP = 640                     # 622 -> 640


def _round_up(n, m):
    return ((n + m - 1) // m) * m


def convtranspose_net_kernel(x_ref, w1_ref, b1_ref, w2_ref, b2_ref,
                             m1_ref, m2_ref, c1_ref, c2_ref, out_ref):
    # ----- MLP head: two Linear + ReLU (MXU matmuls, lane-aligned) -----
    h = jnp.dot(x_ref[...], w1_ref[...],
                preferred_element_type=jnp.float32) + b1_ref[...]          # (TB, 128)
    h = jnp.maximum(h, 0.0)
    h = jnp.dot(h, w2_ref[...],
                preferred_element_type=jnp.float32) + b2_ref[...]          # (TB, 256)
    h = jnp.maximum(h, 0.0)

    # ----- ConvTranspose1d(k=4, s=1) as a precomputed banded matmul -----
    h = jnp.maximum(jnp.dot(h, m1_ref[...],
                            preferred_element_type=jnp.float32), 0.0)      # (TB, 256)

    # ----- Conv1d(k=1, bias=False): scalar scale, then ReLU -----
    h = jnp.maximum(h * c1_ref[0], 0.0)

    # ----- ConvTranspose1d(k=22, s=3) as a precomputed banded matmul -----
    h = jnp.maximum(jnp.dot(h, m2_ref[...],
                            preferred_element_type=jnp.float32), 0.0)      # (TB, 640)

    # ----- Conv1d(k=1, bias=False): scalar scale, then ReLU -----
    out_ref[...] = jnp.maximum(h * c2_ref[0], 0.0)


def _banded_matrices(wct1, wct2):
    """Build the two conv-transpose banded matrices in the wrapper (XLA, once)."""
    # out[t] = sum_l x[l] * w[t - l], 0 <= t - l < K1
    d1 = jnp.arange(L3)[None, :] - jnp.arange(H2)[:, None]
    m1 = jnp.where((d1 >= 0) & (d1 < K1),
                   wct1[0][jnp.clip(d1, 0, K1 - 1)], 0.0).astype(jnp.float32)
    # out[t] = sum_l x[l] * w[t - 3*l], 0 <= t - 3*l < K2
    d2 = jnp.arange(L_OUT)[None, :] - S2 * jnp.arange(L3)[:, None]
    m2 = jnp.where((d2 >= 0) & (d2 < K2),
                   wct2[0][jnp.clip(d2, 0, K2 - 1)], 0.0).astype(jnp.float32)
    return m1, m2


@jax.jit
def convtranspose_net(x, params):
    """x: (B, 1, 2) float32 (NCL like PyTorch). Returns (B, 1, 622)."""
    B = x.shape[0]
    w1, b1, w2, b2, wct1, c1, wct2, c2 = params

    # Precompute banded conv-transpose matrices once, outside the kernel.
    m1, m2 = _banded_matrices(wct1, wct2)

    # Zero-pad every lane dim to a 128-multiple; zeros propagate harmlessly
    # through matmul / bias(0) / ReLU and are sliced off at the end.
    w1p = jnp.pad(w1.astype(jnp.float32), ((0, 0), (0, H1P - H1)))
    b1p = jnp.pad(b1.astype(jnp.float32), ((0, 0), (0, H1P - H1)))
    w2p = jnp.pad(w2.astype(jnp.float32), ((0, H1P - H1), (0, H2P - H2)))
    b2p = jnp.pad(b2.astype(jnp.float32), ((0, 0), (0, H2P - H2)))
    m1p = jnp.pad(m1, ((0, H2P - H2), (0, L3P - L3)))
    m2p = jnp.pad(m2, ((0, L3P - L3), (0, LOP - L_OUT)))
    c1s = c1.reshape(1).astype(jnp.float32)   # flat 1-D SMEM scalar
    c2s = c2.reshape(1).astype(jnp.float32)

    # Batch tiling: pad batch to >= 8 sublanes; tile TB rows per grid step.
    TB = 128
    B_pad = _round_up(B, 8)
    if B_pad <= TB:
        TB = B_pad
    else:
        B_pad = _round_up(B, TB)
    nb = B_pad // TB

    x2 = jnp.pad(x.reshape(B, D_IN).astype(jnp.float32), ((0, B_pad - B), (0, 0)))

    def _const2d(shape):
        # Full-array VMEM block, constant across the batch grid.
        return pl.BlockSpec(shape, lambda i: (0, 0))

    smem = pl.BlockSpec(memory_space=pltpu.MemorySpace.SMEM)

    out = pl.pallas_call(
        convtranspose_net_kernel,
        out_shape=jax.ShapeDtypeStruct((B_pad, LOP), jnp.float32),
        grid=(nb,),
        in_specs=[
            pl.BlockSpec((TB, D_IN), lambda i: (i, 0)),   # x tile
            _const2d((D_IN, H1P)),                        # W1
            _const2d((1, H1P)),                           # b1
            _const2d((H1P, H2P)),                         # W2
            _const2d((1, H2P)),                           # b2
            _const2d((H2P, L3P)),                         # banded M1
            _const2d((L3P, LOP)),                         # banded M2
            smem,                                         # c1 scalar
            smem,                                         # c2 scalar
        ],
        out_specs=pl.BlockSpec((TB, LOP), lambda i: (i, 0)),
        compiler_params=pltpu.CompilerParams(
            dimension_semantics=("parallel",)),
    )(x2, w1p, b1p, w2p, b2p, m1p, m2p, c1s, c2s)

    return out[:B, :L_OUT].reshape(B, 1, L_OUT)


def init_params(key):
    """Deterministic synthetic parameters matching the PyTorch module's shapes."""
    ks = jax.random.split(key, 8)
    lim1 = 1.0 / np.sqrt(D_IN)
    w1 = jax.random.uniform(ks[0], (D_IN, H1), jnp.float32, -lim1, lim1)   # Linear(2, 99)
    b1 = jax.random.uniform(ks[1], (1, H1), jnp.float32, -lim1, lim1)
    lim2 = 1.0 / np.sqrt(H1)
    w2 = jax.random.uniform(ks[2], (H1, H2), jnp.float32, -lim2, lim2)     # Linear(99, 198)
    b2 = jax.random.uniform(ks[3], (1, H2), jnp.float32, -lim2, lim2)
    wct1 = jax.random.uniform(ks[4], (1, K1), jnp.float32, -0.5, 0.5)      # ConvTranspose1d k=4
    c1 = jax.random.uniform(ks[5], (1, 1), jnp.float32, 0.2, 1.0)          # Conv1d k=1
    wct2 = jax.random.uniform(ks[6], (1, K2), jnp.float32, -0.25, 0.25)    # ConvTranspose1d k=22
    c2 = jax.random.uniform(ks[7], (1, 1), jnp.float32, 0.2, 1.0)          # Conv1d k=1
    return (w1, b1, w2, b2, wct1, c1, wct2, c2)


def reference_forward(x, params):
    """Pure-numpy reference implementing PyTorch semantics directly."""
    w1, b1, w2, b2, wct1, c1, wct2, c2 = [np.asarray(p, np.float32) for p in params]
    B = x.shape[0]
    h = np.maximum(x.reshape(B, D_IN) @ w1 + b1, 0.0)
    h = np.maximum(h @ w2 + b2, 0.0)
    o = np.zeros((B, L3), np.float32)                 # ConvTranspose1d(k=4, s=1)
    for l in range(H2):
        for k in range(K1):
            o[:, l * S1 + k] += h[:, l] * wct1[0, k]
    h = np.maximum(o, 0.0)
    h = np.maximum(h * c1[0, 0], 0.0)                 # Conv1d(k=1) + ReLU
    o = np.zeros((B, L_OUT), np.float32)              # ConvTranspose1d(k=22, s=3)
    for l in range(L3):
        for k in range(K2):
            o[:, l * S2 + k] += h[:, l] * wct2[0, k]
    h = np.maximum(o, 0.0)
    return np.maximum(h * c2[0, 0], 0.0).reshape(B, 1, L_OUT)


if __name__ == "__main__":
    key = jax.random.PRNGKey(0)
    pkey, xkey = jax.random.split(key)
    params = init_params(pkey)

    B = 4
    x = jax.random.normal(xkey, (B, 1, D_IN), jnp.float32)   # (B, C=1, 2) NCL

    out = convtranspose_net(x, params)
    out = jax.block_until_ready(out)

    ref = reference_forward(np.asarray(x), params)
    np.testing.assert_allclose(np.asarray(out), ref, rtol=2e-2, atol=1e-3)
    assert out.shape == (B, 1, L_OUT)

    print("KERNEL_OK")
</pallas_src>

<mosaic_0001>
module attributes {stable_mosaic.version = 11 : i64} {
  func.func @convtranspose_net_kernel(%arg0: i32, %arg1: memref<8x2xf32, #tpu.memory_space<vmem>>, %arg2: memref<2x128xf32, #tpu.memory_space<vmem>>, %arg3: memref<1x128xf32, #tpu.memory_space<vmem>>, %arg4: memref<128x256xf32, #tpu.memory_space<vmem>>, %arg5: memref<1x256xf32, #tpu.memory_space<vmem>>, %arg6: memref<256x256xf32, #tpu.memory_space<vmem>>, %arg7: memref<256x640xf32, #tpu.memory_space<vmem>>, %arg8: memref<1xf32, #tpu.memory_space<smem>>, %arg9: memref<1xf32, #tpu.memory_space<smem>>, %arg10: memref<8x640xf32, #tpu.memory_space<vmem>>) attributes {dimension_semantics = [#tpu.dimension_semantics<parallel>], iteration_bounds = array<i64: 1>, scalar_prefetch = 0 : i64, scratch_operands = 0 : i64, tpu.core_type = #tpu.core_type<tc>, window_params = [{transform_indices = @transform_0, window_bounds = array<i64: 8, 2>}, {pipeline_mode = #tpu.pipeline_mode<synchronous>, transform_indices = @transform_1, window_bounds = array<i64: 2, 128>}, {pipeline_mode = #tpu.pipeline_mode<synchronous>, transform_indices = @transform_2, window_bounds = array<i64: 1, 128>}, {pipeline_mode = #tpu.pipeline_mode<synchronous>, transform_indices = @transform_3, window_bounds = array<i64: 128, 256>}, {pipeline_mode = #tpu.pipeline_mode<synchronous>, transform_indices = @transform_4, window_bounds = array<i64: 1, 256>}, {pipeline_mode = #tpu.pipeline_mode<synchronous>, transform_indices = @transform_5, window_bounds = array<i64: 256, 256>}, {pipeline_mode = #tpu.pipeline_mode<synchronous>, transform_indices = @transform_6, window_bounds = array<i64: 256, 640>}, {transform_indices = @transform_7, window_bounds = array<i64: 1>}, {transform_indices = @transform_8, window_bounds = array<i64: 1>}, {transform_indices = @transform_9, window_bounds = array<i64: 8, 640>}]} {
    %c0 = arith.constant 0 : index
    %c0_0 = arith.constant 0 : index
    %0 = vector.load %arg1[%c0, %c0_0] : memref<8x2xf32, #tpu.memory_space<vmem>>, vector<8x2xf32>
    %c0_1 = arith.constant 0 : index
    %c0_2 = arith.constant 0 : index
    %1 = vector.load %arg2[%c0_1, %c0_2] : memref<2x128xf32, #tpu.memory_space<vmem>>, vector<2x128xf32>
    %cst = arith.constant dense<0.000000e+00> : vector<8x128xf32>
    %2 = tpu.matmul %0, %1, %cst {dimension_numbers = #tpu.dot_dimension_numbers<[1], [0], [0], [1], [0, 0, 1, 1], [], []>} : vector<8x2xf32>, vector<2x128xf32>, vector<8x128xf32> -> vector<8x128xf32>
    %c0_3 = arith.constant 0 : index
    %c0_4 = arith.constant 0 : index
    %3 = vector.load %arg3[%c0_3, %c0_4] : memref<1x128xf32, #tpu.memory_space<vmem>>, vector<1x128xf32>
    %4 = vector.broadcast %3 : vector<1x128xf32> to vector<8x128xf32>
    %5 = arith.addf %2, %4 : vector<8x128xf32>
    %cst_5 = arith.constant 0.000000e+00 : f32
    %6 = vector.broadcast %cst_5 : f32 to vector<8x128xf32>
    %7 = arith.maximumf %5, %6 : vector<8x128xf32>
    %c0_6 = arith.constant 0 : index
    %c0_7 = arith.constant 0 : index
    %8 = vector.load %arg4[%c0_6, %c0_7] : memref<128x256xf32, #tpu.memory_space<vmem>>, vector<128x256xf32>
    %cst_8 = arith.constant dense<0.000000e+00> : vector<8x256xf32>
    %9 = tpu.matmul %7, %8, %cst_8 {dimension_numbers = #tpu.dot_dimension_numbers<[1], [0], [0], [1], [0, 0, 1, 1], [], []>} : vector<8x128xf32>, vector<128x256xf32>, vector<8x256xf32> -> vector<8x256xf32>
    %c0_9 = arith.constant 0 : index
    %c0_10 = arith.constant 0 : index
    %10 = vector.load %arg5[%c0_9, %c0_10] : memref<1x256xf32, #tpu.memory_space<vmem>>, vector<1x256xf32>
    %11 = vector.broadcast %10 : vector<1x256xf32> to vector<8x256xf32>
    %12 = arith.addf %9, %11 : vector<8x256xf32>
    %cst_11 = arith.constant 0.000000e+00 : f32
    %13 = vector.broadcast %cst_11 : f32 to vector<8x256xf32>
    %14 = arith.maximumf %12, %13 : vector<8x256xf32>
    %c0_12 = arith.constant 0 : index
    %c0_13 = arith.constant 0 : index
    %15 = vector.load %arg6[%c0_12, %c0_13] : memref<256x256xf32, #tpu.memory_space<vmem>>, vector<256x256xf32>
    %cst_14 = arith.constant dense<0.000000e+00> : vector<8x256xf32>
    %16 = tpu.matmul %14, %15, %cst_14 {dimension_numbers = #tpu.dot_dimension_numbers<[1], [0], [0], [1], [0, 0, 1, 1], [], []>} : vector<8x256xf32>, vector<256x256xf32>, vector<8x256xf32> -> vector<8x256xf32>
    %cst_15 = arith.constant 0.000000e+00 : f32
    %17 = vector.broadcast %cst_15 : f32 to vector<8x256xf32>
    %18 = arith.maximumf %16, %17 : vector<8x256xf32>
    %c0_16 = arith.constant 0 : index
    %19 = memref.load %arg8[%c0_16] : memref<1xf32, #tpu.memory_space<smem>>
    %20 = vector.broadcast %19 : f32 to vector<8x256xf32>
    %21 = arith.mulf %18, %20 : vector<8x256xf32>
    %cst_17 = arith.constant 0.000000e+00 : f32
    %22 = vector.broadcast %cst_17 : f32 to vector<8x256xf32>
    %23 = arith.maximumf %21, %22 : vector<8x256xf32>
    %c0_18 = arith.constant 0 : index
    %c0_19 = arith.constant 0 : index
    %24 = vector.load %arg7[%c0_18, %c0_19] : memref<256x640xf32, #tpu.memory_space<vmem>>, vector<256x640xf32>
    %cst_20 = arith.constant dense<0.000000e+00> : vector<8x640xf32>
    %25 = tpu.matmul %23, %24, %cst_20 {dimension_numbers = #tpu.dot_dimension_numbers<[1], [0], [0], [1], [0, 0, 1, 1], [], []>} : vector<8x256xf32>, vector<256x640xf32>, vector<8x640xf32> -> vector<8x640xf32>
    %cst_21 = arith.constant 0.000000e+00 : f32
    %26 = vector.broadcast %cst_21 : f32 to vector<8x640xf32>
    %27 = arith.maximumf %25, %26 : vector<8x640xf32>
    %c0_22 = arith.constant 0 : index
    %28 = memref.load %arg9[%c0_22] : memref<1xf32, #tpu.memory_space<smem>>
    %29 = vector.broadcast %28 : f32 to vector<8x640xf32>
    %30 = arith.mulf %27, %29 : vector<8x640xf32>
    %cst_23 = arith.constant 0.000000e+00 : f32
    %31 = vector.broadcast %cst_23 : f32 to vector<8x640xf32>
    %32 = arith.maximumf %30, %31 : vector<8x640xf32>
    %c0_24 = arith.constant 0 : index
    %c0_25 = arith.constant 0 : index
    %33 = vector.load %arg10[%c0_24, %c0_25] : memref<8x640xf32, #tpu.memory_space<vmem>>, vector<8x640xf32>
    tpu.vector_store %arg10[%c0_24, %c0_25], %32 {strides = array<i32>} : memref<8x640xf32, #tpu.memory_space<vmem>>, vector<8x640xf32>,
    return
  }
  func.func @transform_0(%arg0: i32) -> (i32, i32) {
    %c0_i32 = arith.constant 0 : i32
    %c0_i32_0 = arith.constant 0 : i32
    return %arg0, %c0_i32 : i32, i32
  }
  func.func @transform_1(%arg0: i32) -> (i32, i32) {
    %c0_i32 = arith.constant 0 : i32
    %c0_i32_0 = arith.constant 0 : i32
    %c0_i32_1 = arith.constant 0 : i32
    return %c0_i32, %c0_i32_0 : i32, i32
  }
  func.func @transform_2(%arg0: i32) -> (i32, i32) {
    %c0_i32 = arith.constant 0 : i32
    %c0_i32_0 = arith.constant 0 : i32
    %c0_i32_1 = arith.constant 0 : i32
    return %c0_i32, %c0_i32_0 : i32, i32
  }
  func.func @transform_3(%arg0: i32) -> (i32, i32) {
    %c0_i32 = arith.constant 0 : i32
    %c0_i32_0 = arith.constant 0 : i32
    %c0_i32_1 = arith.constant 0 : i32
    return %c0_i32, %c0_i32_0 : i32, i32
  }
  func.func @transform_4(%arg0: i32) -> (i32, i32) {
    %c0_i32 = arith.constant 0 : i32
    %c0_i32_0 = arith.constant 0 : i32
    %c0_i32_1 = arith.constant 0 : i32
    return %c0_i32, %c0_i32_0 : i32, i32
  }
  func.func @transform_5(%arg0: i32) -> (i32, i32) {
    %c0_i32 = arith.constant 0 : i32
    %c0_i32_0 = arith.constant 0 : i32
    %c0_i32_1 = arith.constant 0 : i32
    return %c0_i32, %c0_i32_0 : i32, i32
  }
  func.func @transform_6(%arg0: i32) -> (i32, i32) {
    %c0_i32 = arith.constant 0 : i32
    %c0_i32_0 = arith.constant 0 : i32
    %c0_i32_1 = arith.constant 0 : i32
    return %c0_i32, %c0_i32_0 : i32, i32
  }
  func.func @transform_7(%arg0: i32) -> i32 {
    %c0_i32 = arith.constant 0 : i32
    %c0_i32_0 = arith.constant 0 : i32
    return %c0_i32 : i32
  }
  func.func @transform_8(%arg0: i32) -> i32 {
    %c0_i32 = arith.constant 0 : i32
    %c0_i32_0 = arith.constant 0 : i32
    return %c0_i32 : i32
  }
  func.func @transform_9(%arg0: i32) -> (i32, i32) {
    %c0_i32 = arith.constant 0 : i32
    %c0_i32_0 = arith.constant 0 : i32
    return %arg0, %c0_i32 : i32, i32
  }
}

</mosaic_0001>

<bundles_post_ra>
// kernel: convtranspose_net.1
= control target key start
LH: loop header
LB: loop body
LE: loop exit
PB: predicated region body
PF: predicated region fallthrough
CT: control target
= control target key end

     0   :  { %vm44_vm0 = vcmask 1041408   ;;  %vm40_vm1 = vcmask 15360   ;;  %s1555_s1 = inlined_call_operand.vmem [shape: f32[2,128], index: 1, kind: input, shape index: {}]   ;;  %s1556_s0 = inlined_call_operand.vmem [shape: f32[8,2], index: 0, kind: input, shape index: {}]   ;;  %s1557_s3 = inlined_call_operand.vmem [shape: f32[128,256], index: 3, kind: input, shape index: {}]   ;;  %s1558_s2 = inlined_call_operand.vmem [shape: f32[1,128], index: 2, kind: input, shape index: {}]   ;;  %s1559_s5 = inlined_call_operand.vmem [shape: f32[256,256], index: 5, kind: input, shape index: {}]   ;;  %s1560_s6 = inlined_call_operand.vmem [shape: f32[256,640], index: 6, kind: input, shape index: {}]   ;;  %s1561_s4 = inlined_call_operand.vmem [shape: f32[1,256], index: 4, kind: input, shape index: {}]   ;;  %s1562_s7 = inlined_call_operand.<no memory space> [shape: f32[1], index: 7, kind: input, shape index: {}]   ;;  %s1563_s8 = inlined_call_operand.<no memory space> [shape: f32[1], index: 8, kind: input, shape index: {}]   ;;  %s1564_s9 = inlined_call_operand.vmem [shape: f32[8,640], index: 9, kind: output, shape index: {}]  }
   0x1   :  { %v35_v0 = vld [vmem:[%s1555_s1] sm:$0x3]  ;;  %v99_v2 = vld [vmem:[%s1557_s3 + $0xf0] sm:$0xff]  ;;  %v100_v3 = vld [vmem:[%s1557_s3 + $0xf8] sm:$0xff] }
   0x2   :  { %v34_v1 = vld [vmem:[%s1556_s0] sm:$0xff]  ;;  %687 = vmatpush.msk.msra.mxu0 %vm44_vm0, %v35_v0  ;;  %107 = vmatpush.msra.mxu1 %v99_v2  ;;  %v98_v5 = vld [vmem:[%s1557_s3 + $0xe8] sm:$0xff]  ;;  %v95_v6 = vld [vmem:[%s1557_s3 + $0xd0] sm:$0xff] }
   0x3   :  { %v97_v4 = vld [vmem:[%s1557_s3 + $0xe0] sm:$0xff]  ;;  %688 = vmatmul.msk.f32.vlgmr.msra.gmra.mxu0 %vm40_vm1, %v34_v1  ;;  %127 = vmatpush.msra.mxu2 %v100_v3  ;;  %v96_v7 = vld [vmem:[%s1557_s3 + $0xd8] sm:$0xff]  ;;  %v94_v9 = vld [vmem:[%s1557_s3 + $0xc8] sm:$0xff] }
   0x4   :  { %108 = vmatpush.msra.mxu1 %v97_v4  ;;  %v93_v8 = vld [vmem:[%s1557_s3 + $0xc0] sm:$0xff]  ;;  %v91_v10 = vld [vmem:[%s1557_s3 + $0xb0] sm:$0xff]  ;;  %v92_v11 = vld [vmem:[%s1557_s3 + $0xb8] sm:$0xff] }
   0x5   :  { %128 = vmatpush.msra.mxu2 %v98_v5  ;;  %v89_v12 = vld [vmem:[%s1557_s3 + $0xa0] sm:$0xff]  ;;  %v90_v13 = vld [vmem:[%s1557_s3 + $0xa8] sm:$0xff]  ;;  %v87_v14 = vld [vmem:[%s1557_s3 + $0x90] sm:$0xff] }
   0x6   :  { %109 = vmatpush.msra.mxu1 %v95_v6  ;;  %v88_v15 = vld [vmem:[%s1557_s3 + $0x98] sm:$0xff]  ;;  %v85_v16 = vld [vmem:[%s1557_s3 + $0x80] sm:$0xff]  ;;  %v86_v17 = vld [vmem:[%s1557_s3 + $0x88] sm:$0xff] }
   0x7   :  { %129 = vmatpush.msra.mxu2 %v96_v7  ;;  %v83_v18 = vld [vmem:[%s1557_s3 + $0x70] sm:$0xff]  ;;  %v84_v19 = vld [vmem:[%s1557_s3 + $0x78] sm:$0xff]  ;;  %v81_v20 = vld [vmem:[%s1557_s3 + $0x60] sm:$0xff] }
   0x8   :  { %110 = vmatpush.msra.mxu1 %v93_v8  ;;  %v82_v21 = vld [vmem:[%s1557_s3 + $0x68] sm:$0xff]  ;;  %v79_v22 = vld [vmem:[%s1557_s3 + $0x50] sm:$0xff]  ;;  %v80_v23 = vld [vmem:[%s1557_s3 + $0x58] sm:$0xff] }
   0x9   :  { %130 = vmatpush.msra.mxu2 %v94_v9  ;;  %v77_v24 = vld [vmem:[%s1557_s3 + $0x40] sm:$0xff]  ;;  %v78_v25 = vld [vmem:[%s1557_s3 + $0x48] sm:$0xff]  ;;  %v75_v26 = vld [vmem:[%s1557_s3 + $0x30] sm:$0xff] }
   0xa   :  { %111 = vmatpush.msra.mxu1 %v91_v10  ;;  %v76_v27 = vld [vmem:[%s1557_s3 + $0x38] sm:$0xff]  ;;  %v73_v28 = vld [vmem:[%s1557_s3 + $0x20] sm:$0xff]  ;;  %v74_v29 = vld [vmem:[%s1557_s3 + $0x28] sm:$0xff] }
   0xb   :  { %131 = vmatpush.msra.mxu2 %v92_v11  ;;  %v71_v30 = vld [vmem:[%s1557_s3 + $0x10] sm:$0xff]  ;;  %v72_v31 = vld [vmem:[%s1557_s3 + $0x18] sm:$0xff]  ;;  %v69_v32 = vld [vmem:[%s1557_s3] sm:$0xff] }
   0xc   :  { %112 = vmatpush.msra.mxu1 %v89_v12  ;;  %v70_v33 = vld [vmem:[%s1557_s3 + $0x8] sm:$0xff]  ;;  %v179_v34 = vld [vmem:[%s1559_s5 + $0xf0] sm:$0xff]  ;;  %v180_v35 = vld [vmem:[%s1559_s5 + $0xf8] sm:$0xff] }
   0xd   :  { %132 = vmatpush.msra.mxu2 %v90_v13  ;;  %v177_v36 = vld [vmem:[%s1559_s5 + $0xe0] sm:$0xff]  ;;  %213 = vmatpush.msra.mxu3 %v179_v34  ;;  %v178_v37 = vld [vmem:[%s1559_s5 + $0xe8] sm:$0xff]  ;;  %v175_v38 = vld [vmem:[%s1559_s5 + $0xd0] sm:$0xff] }
   0xe   :  { %113 = vmatpush.msra.mxu1 %v87_v14  ;;  %v176_v39 = vld [vmem:[%s1559_s5 + $0xd8] sm:$0xff]  ;;  %v211_v40 = vld [vmem:[%s1559_s5 + $0x1f0] sm:$0xff]  ;;  %v209_v42 = vld [vmem:[%s1559_s5 + $0x1e0] sm:$0xff] }
   0xf   :  { %133 = vmatpush.msra.mxu2 %v88_v15  ;;  %214 = vmatpush.msra.mxu3 %v177_v36  ;;  %v212_v41 = vld [vmem:[%s1559_s5 + $0x1f8] sm:$0xff]  ;;  %v173_v43 = vld [vmem:[%s1559_s5 + $0xc0] sm:$0xff]  ;;  %v174_v44 = vld [vmem:[%s1559_s5 + $0xc8] sm:$0xff] }
  0x10   :  { %114 = vmatpush.msra.mxu1 %v85_v16  ;;  %233 = vmatpush.msrb.mxu0 %v211_v40  ;;  %v210_v45 = vld [vmem:[%s1559_s5 + $0x1e8] sm:$0xff]  ;;  %v207_v46 = vld [vmem:[%s1559_s5 + $0x1d0] sm:$0xff]  ;;  %v208_v47 = vld [vmem:[%s1559_s5 + $0x1d8] sm:$0xff] }
  0x11   :  { %134 = vmatpush.msra.mxu2 %v86_v17  ;;  %215 = vmatpush.msra.mxu3 %v175_v38  ;;  %v171_v48 = vld [vmem:[%s1559_s5 + $0xb0] sm:$0xff]  ;;  %v172_v49 = vld [vmem:[%s1559_s5 + $0xb8] sm:$0xff]  ;;  %v205_v50 = vld [vmem:[%s1559_s5 + $0x1c0] sm:$0xff] }
  0x12   :  { %115 = vmatpush.msra.mxu1 %v83_v18  ;;  %234 = vmatpush.msrb.mxu0 %v209_v42  ;;  %v206_v51 = vld [vmem:[%s1559_s5 + $0x1c8] sm:$0xff]  ;;  %v169_v52 = vld [vmem:[%s1559_s5 + $0xa0] sm:$0xff]  ;;  %v203_v54 = vld [vmem:[%s1559_s5 + $0x1b0] sm:$0xff] }
  0x13   :  { %135 = vmatpush.msra.mxu2 %v84_v19  ;;  %216 = vmatpush.msra.mxu3 %v173_v43  ;;  %v170_v53 = vld [vmem:[%s1559_s5 + $0xa8] sm:$0xff]  ;;  %v204_v55 = vld [vmem:[%s1559_s5 + $0x1b8] sm:$0xff]  ;;  %v167_v56 = vld [vmem:[%s1559_s5 + $0x90] sm:$0xff] }
  0x14   :  { %116 = vmatpush.msra.mxu1 %v81_v20  ;;  %235 = vmatpush.msrb.mxu0 %v207_v46  ;;  %v168_v57 = vld [vmem:[%s1559_s5 + $0x98] sm:$0xff]  ;;  %v201_v58 = vld [vmem:[%s1559_s5 + $0x1a0] sm:$0xff]  ;;  %v202_v59 = vld [vmem:[%s1559_s5 + $0x1a8] sm:$0xff] }
  0x15   :  { %136 = vmatpush.msra.mxu2 %v82_v21  ;;  %217 = vmatpush.msra.mxu3 %v171_v48  ;;  %v165_v60 = vld [vmem:[%s1559_s5 + $0x80] sm:$0xff]  ;;  %v166_v61 = vld [vmem:[%s1559_s5 + $0x88] sm:$0xff]  ;;  %v199_v62 = vld [vmem:[%s1559_s5 + $0x190] sm:$0xff] }
  0x16   :  { %117 = vmatpush.msra.mxu1 %v79_v22  ;;  %236 = vmatpush.msrb.mxu0 %v205_v50  ;;  %v200_v63 = vld [vmem:[%s1559_s5 + $0x198] sm:$0xff]  ;;  %v163_v0 = vld [vmem:[%s1559_s5 + $0x70] sm:$0xff]  ;;  %v197_v2 = vld [vmem:[%s1559_s5 + $0x180] sm:$0xff] }
  0x17   :  { %137 = vmatpush.msra.mxu2 %v80_v23  ;;  %218 = vmatpush.msra.mxu3 %v169_v52  ;;  %v164_v1 = vld [vmem:[%s1559_s5 + $0x78] sm:$0xff]  ;;  %v198_v3 = vld [vmem:[%s1559_s5 + $0x188] sm:$0xff]  ;;  %v161_v4 = vld [vmem:[%s1559_s5 + $0x60] sm:$0xff] }
  0x18   :  { %118 = vmatpush.msra.mxu1 %v77_v24  ;;  %237 = vmatpush.msrb.mxu0 %v203_v54  ;;  %v162_v5 = vld [vmem:[%s1559_s5 + $0x68] sm:$0xff]  ;;  %v195_v6 = vld [vmem:[%s1559_s5 + $0x170] sm:$0xff]  ;;  %v196_v7 = vld [vmem:[%s1559_s5 + $0x178] sm:$0xff] }
  0x19   :  { %138 = vmatpush.msra.mxu2 %v78_v25  ;;  %219 = vmatpush.msra.mxu3 %v167_v56  ;;  %v159_v8 = vld [vmem:[%s1559_s5 + $0x50] sm:$0xff]  ;;  %v160_v9 = vld [vmem:[%s1559_s5 + $0x58] sm:$0xff]  ;;  %v193_v10 = vld [vmem:[%s1559_s5 + $0x160] sm:$0xff] }
  0x1a   :  { %119 = vmatpush.msra.mxu1 %v75_v26  ;;  %238 = vmatpush.msrb.mxu0 %v201_v58  ;;  %v194_v11 = vld [vmem:[%s1559_s5 + $0x168] sm:$0xff]  ;;  %v157_v12 = vld [vmem:[%s1559_s5 + $0x40] sm:$0xff]  ;;  %v155_v14 = vld [vmem:[%s1559_s5 + $0x30] sm:$0xff] }
  0x1b   :  { %139 = vmatpush.msra.mxu2 %v76_v27  ;;  %220 = vmatpush.msra.mxu3 %v165_v60  ;;  %v158_v13 = vld [vmem:[%s1559_s5 + $0x48] sm:$0xff]  ;;  %v156_v15 = vld [vmem:[%s1559_s5 + $0x38] sm:$0xff]  ;;  %v689_v16 = vld [vmem:[%s1558_s2] ss:$0 sm:$0xff] }
  0x1c   :  { %120 = vmatpush.msra.mxu1 %v73_v28  ;;  %239 = vmatpush.msrb.mxu0 %v199_v62  ;;  %v153_v20 = vld [vmem:[%s1559_s5 + $0x20] sm:$0xff]  ;;  %v191_v21 = vld [vmem:[%s1559_s5 + $0x150] sm:$0xff]  ;;  %v154_v22 = vld [vmem:[%s1559_s5 + $0x28] sm:$0xff] }
  0x1d   :  { %140 = vmatpush.msra.mxu2 %v74_v29  ;;  %221 = vmatpush.msra.mxu3 %v163_v0  ;;  %v192_v23 = vld [vmem:[%s1559_s5 + $0x158] sm:$0xff]  ;;  %v151_v24 = vld [vmem:[%s1559_s5 + $0x10] sm:$0xff]  ;;  %v189_v25 = vld [vmem:[%s1559_s5 + $0x140] sm:$0xff] }
  0x1e   :  { %121 = vmatpush.msra.mxu1 %v71_v30  ;;  %240 = vmatpush.msrb.mxu0 %v197_v2  ;;  %v152_v26 = vld [vmem:[%s1559_s5 + $0x18] sm:$0xff]  ;;  %v190_v27 = vld [vmem:[%s1559_s5 + $0x148] sm:$0xff]  ;;  %v149_v28 = vld [vmem:[%s1559_s5] sm:$0xff] }
  0x1f   :  { %141 = vmatpush.msra.mxu2 %v72_v31  ;;  %222 = vmatpush.msra.mxu3 %v161_v4  ;;  %v187_v29 = vld [vmem:[%s1559_s5 + $0x130] sm:$0xff]  ;;  %v150_v30 = vld [vmem:[%s1559_s5 + $0x8] sm:$0xff]  ;;  %v188_v31 = vld [vmem:[%s1559_s5 + $0x138] sm:$0xff] }
  0x20   :  { %122 = vmatpush.msra.mxu1 %v69_v32  ;;  %241 = vmatpush.msrb.mxu0 %v195_v6  ;;  %v185_v32 = vld [vmem:[%s1559_s5 + $0x120] sm:$0xff]  ;;  %v183_v34 = vld [vmem:[%s1559_s5 + $0x110] sm:$0xff]  ;;  %v376_v38 = vld [vmem:[%s1560_s6 + $0x258] sm:$0xff] }
  0x21   :  { %142 = vmatpush.msra.mxu2 %v70_v33  ;;  %223 = vmatpush.msra.mxu3 %v159_v8  ;;  %v186_v33 = vld [vmem:[%s1559_s5 + $0x128] sm:$0xff]  ;;  %v181_v36 = vld [vmem:[%s1559_s5 + $0x100] sm:$0xff]  ;;  %v456_v40 = vld [vmem:[%s1560_s6 + $0x4d8] sm:$0xff] }
  0x22   :  { %253 = vmatpush.msrb.mxu1 %v180_v35  ;;  %242 = vmatpush.msrb.mxu0 %v193_v10  ;;  %v184_v35 = vld [vmem:[%s1559_s5 + $0x118] sm:$0xff]  ;;  %v451_v42 = vld [vmem:[%s1560_s6 + $0x4b0] sm:$0xff]  ;;  %v377_v43 = vld [vmem:[%s1560_s6 + $0x260] sm:$0xff] }
  0x23   :  { %273 = vmatpush.msrb.mxu2 %v212_v41  ;;  %224 = vmatpush.msra.mxu3 %v157_v12  ;;  %v366_v41 = vld [vmem:[%s1560_s6 + $0x208] sm:$0xff]  ;;  %v361_v46 = vld [vmem:[%s1560_s6 + $0x1e0] sm:$0xff]  ;;  %v356_v50 = vld [vmem:[%s1560_s6 + $0x1b8] sm:$0xff] }
  0x24   :  { %254 = vmatpush.msrb.mxu1 %v178_v37  ;;  %243 = vmatpush.msrb.mxu0 %v191_v21  ;;  %v182_v37 = vld [vmem:[%s1559_s5 + $0x108] sm:$0xff]  ;;  %v441_v48 = vld [vmem:[%s1560_s6 + $0x460] sm:$0xff]  ;;  %v436_v52 = vld [vmem:[%s1560_s6 + $0x438] sm:$0xff] }
  0x25   :  { %274 = vmatpush.msrb.mxu2 %v210_v45  ;;  %225 = vmatpush.msra.mxu3 %v155_v14  ;;  %v372_v45 = vld [vmem:[%s1560_s6 + $0x238] sm:$0xff]  ;;  %v351_v54 = vld [vmem:[%s1560_s6 + $0x190] sm:$0xff]  ;;  %v442_v58 = vld [vmem:[%s1560_s6 + $0x468] sm:$0xff] }
  0x26   :  { %255 = vmatpush.msrb.mxu1 %v176_v39  ;;  %244 = vmatpush.msrb.mxu0 %v189_v25  ;;  %v371_v39 = vld [vmem:[%s1560_s6 + $0x230] sm:$0xff]  ;;  %v352_v60 = vld [vmem:[%s1560_s6 + $0x198] sm:$0xff]  ;;  %v437_v62 = vld [vmem:[%s1560_s6 + $0x440] sm:$0xff] }
  0x27   :  { %275 = vmatpush.msrb.mxu2 %v208_v47  ;;  %226 = vmatpush.msra.mxu3 %v153_v20  ;;  %v367_v47 = vld [vmem:[%s1560_s6 + $0x210] sm:$0xff]  ;;  %v432_v2 = vld [vmem:[%s1560_s6 + $0x418] sm:$0xff]  ;;  %v342_v4 = vld [vmem:[%s1560_s6 + $0x148] sm:$0xff] }
  0x28   :  { %256 = vmatpush.msrb.mxu1 %v174_v44  ;;  %245 = vmatpush.msrb.mxu0 %v187_v29  ;;  %v446_v44 = vld [vmem:[%s1560_s6 + $0x488] sm:$0xff]  ;;  %v447_v56 = vld [vmem:[%s1560_s6 + $0x490] sm:$0xff]  ;;  %v416_v6 = vld [vmem:[%s1560_s6 + $0x398] sm:$0xff] }
  0x29   :  { %276 = vmatpush.msrb.mxu2 %v206_v51  ;;  %227 = vmatpush.msra.mxu3 %v151_v24  ;;  %v362_v51 = vld [vmem:[%s1560_s6 + $0x1e8] sm:$0xff]  ;;  %v347_v0 = vld [vmem:[%s1560_s6 + $0x170] sm:$0xff]  ;;  %v332_v14 = vld [vmem:[%s1560_s6 + $0xf8] sm:$0xff] }
  0x2a   :  { %257 = vmatpush.msrb.mxu1 %v172_v49  ;;  %246 = vmatpush.msrb.mxu0 %v185_v32  ;;  %v457_v49 = vld [vmem:[%s1560_s6 + $0x4e0] sm:$0xff]  ;;  %v331_v8 = vld [vmem:[%s1560_s6 + $0xf0] sm:$0xff]  ;;  %v412_v21 = vld [vmem:[%s1560_s6 + $0x378] sm:$0xff] }
  0x2b   :  { %277 = vmatpush.msrb.mxu2 %v204_v55  ;;  %228 = vmatpush.msra.mxu3 %v149_v28  ;;  %v357_v55 = vld [vmem:[%s1560_s6 + $0x1c0] sm:$0xff]  ;;  %v411_v10 = vld [vmem:[%s1560_s6 + $0x370] sm:$0xff]  ;;  %v322_v24 = vld [vmem:[%s1560_s6 + $0xa8] sm:$0xff] }
  0x2c   :  { %258 = vmatpush.msrb.mxu1 %v170_v53  ;;  %247 = vmatpush.msrb.mxu0 %v183_v34  ;;  %v452_v53 = vld [vmem:[%s1560_s6 + $0x4b8] sm:$0xff]  ;;  %v401_v20 = vld [vmem:[%s1560_s6 + $0x320] sm:$0xff]  ;;  %v391_v32 = vld [vmem:[%s1560_s6 + $0x2d0] sm:$0xff] }
  0x2d   :  { %278 = vmatpush.msrb.mxu2 %v202_v59  ;;  %461 = vmatpush.msrb.mxu3 %v376_v38  ;;  %v346_v59 = vld [vmem:[%s1560_s6 + $0x168] sm:$0xff]  ;;  %v396_v28 = vld [vmem:[%s1560_s6 + $0x2f8] sm:$0xff]  ;;  %v317_v29 = vld [vmem:[%s1560_s6 + $0x80] sm:$0xff] }
  0x2e   :  { %259 = vmatpush.msrb.mxu1 %v168_v57  ;;  %248 = vmatpush.msrb.mxu0 %v181_v36  ;;  %v431_v57 = vld [vmem:[%s1560_s6 + $0x410] sm:$0xff]  ;;  %v312_v34 = vld [vmem:[%s1560_s6 + $0x58] sm:$0xff]  ;;  %v386_v38 = vld [vmem:[%s1560_s6 + $0x2a8] sm:$0xff] }
  0x2f   :  { %279 = vmatpush.msrb.mxu2 %v200_v63  ;;  %462 = vmatpush.msrb.mxu3 %v371_v39  ;;  %v341_v63 = vld [vmem:[%s1560_s6 + $0x140] sm:$0xff] }
  0x30   :  { %260 = vmatpush.msrb.mxu1 %v166_v61  ;;  %481 = vmatpush.msra.mxu0 %v456_v40  ;;  %v426_v61 = vld [vmem:[%s1560_s6 + $0x3e8] sm:$0xff] }
  0x31   :  { %280 = vmatpush.msrb.mxu2 %v198_v3  ;;  %463 = vmatpush.msrb.mxu3 %v366_v41  ;;  %v336_v3 = vld [vmem:[%s1560_s6 + $0x118] sm:$0xff]  ;;  %v378_v40 = vld [vmem:[%s1560_s6 + $0x268] sm:$0xff]  ;;  %v381_v41 = vld [vmem:[%s1560_s6 + $0x280] sm:$0xff] }
  0x32   :  { %261 = vmatpush.msrb.mxu1 %v164_v1  ;;  %482 = vmatpush.msra.mxu0 %v451_v42  ;;  %v421_v1 = vld [vmem:[%s1560_s6 + $0x3c0] sm:$0xff]  ;;  %v307_v42 = vld [vmem:[%s1560_s6 + $0x30] sm:$0xff] }
  0x33   :  { %281 = vmatpush.msrb.mxu2 %v196_v7  ;;  %464 = vmatpush.msrb.mxu3 %v361_v46  ;;  %v427_v7 = vld [vmem:[%s1560_s6 + $0x3f0] sm:$0xff]  ;;  %v302_v46 = vld [vmem:[%s1560_s6 + $0x8] sm:$0xff] }
  0x34   :  { %262 = vmatpush.msrb.mxu1 %v162_v5  ;;  %483 = vmatpush.msra.mxu0 %v446_v44  ;;  %v101_v5 = vld [vmem:[%s1561_s4] sm:$0x3] }
  0x35   :  { %282 = vmatpush.msrb.mxu2 %v194_v11  ;;  %465 = vmatpush.msrb.mxu3 %v356_v50  ;;  %v422_v11 = vld [vmem:[%s1560_s6 + $0x3c8] sm:$0xff]  ;;  %v103_v12 = vperm.slane %v101_v5, 0  ;;  %v373_v44 = vld [vmem:[%s1560_s6 + $0x240] sm:$0xff]  ;;  %v392_v50 = vld [vmem:[%s1560_s6 + $0x2d8] sm:$0xff] }
  0x36   :  { %263 = vmatpush.msrb.mxu1 %v160_v9  ;;  %484 = vmatpush.msra.mxu0 %v441_v48  ;;  %v337_v9 = vld [vmem:[%s1560_s6 + $0x120] sm:$0xff]  ;;  %v368_v48 = vld [vmem:[%s1560_s6 + $0x218] sm:$0xff] }
  0x37   :  { %283 = vmatpush.msrb.mxu2 %v192_v23  ;;  %466 = vmatpush.msrb.mxu3 %v351_v54  ;;  %v316_v23 = vld [vmem:[%s1560_s6 + $0x78] sm:$0xff]  ;;  %v387_v54 = vld [vmem:[%s1560_s6 + $0x2b0] sm:$0xff] }
  0x38   :  { %264 = vmatpush.msrb.mxu1 %v158_v13  ;;  %485 = vmatpush.msra.mxu0 %v436_v52  ;;  %v326_v13 = vld [vmem:[%s1560_s6 + $0xc8] sm:$0xff]  ;;  %v363_v52 = vld [vmem:[%s1560_s6 + $0x1f0] sm:$0xff] }
  0x39   :  { %284 = vmatpush.msrb.mxu2 %v190_v27  ;;  %467 = vmatpush.msrb.mxu3 %v346_v59  ;;  %v311_v27 = vld [vmem:[%s1560_s6 + $0x50] sm:$0xff]  ;;  %v438_v59 = vld [vmem:[%s1560_s6 + $0x448] sm:$0xff] }
  0x3a   :  { %265 = vmatpush.msrb.mxu1 %v156_v15  ;;  %486 = vmatpush.msra.mxu0 %v431_v57  ;;  %v406_v15 = vld [vmem:[%s1560_s6 + $0x348] sm:$0xff]  ;;  %v369_v57 = vld [vmem:[%s1560_s6 + $0x220] sm:$0xff] }
  0x3b   :  { %285 = vmatpush.msrb.mxu2 %v188_v31  ;;  %468 = vmatpush.msrb.mxu3 %v341_v63  ;;  %v306_v31 = vld [vmem:[%s1560_s6 + $0x28] sm:$0xff]  ;;  %v348_v63 = vld [vmem:[%s1560_s6 + $0x178] sm:$0xff] }
  0x3c   :  { %266 = vmatpush.msrb.mxu1 %v154_v22  ;;  %487 = vmatpush.msra.mxu0 %v426_v61  ;;  %v364_v61 = vld [vmem:[%s1560_s6 + $0x1f8] sm:$0xff] }
  0x3d   :  { %286 = vmatpush.msrb.mxu2 %v186_v33  ;;  %469 = vmatpush.msrb.mxu3 %v336_v3  ;;  %v359_v3 = vld [vmem:[%s1560_s6 + $0x1d0] sm:$0xff] }
  0x3e   :  { %267 = vmatpush.msrb.mxu1 %v152_v26  ;;  %488 = vmatpush.msra.mxu0 %v421_v1  ;;  %v104_v26 = vperm.slane %v101_v5, 1  ;;  %v338_v1 = vld [vmem:[%s1560_s6 + $0x128] sm:$0xff]  ;;  %v333_v5 = vld [vmem:[%s1560_s6 + $0x100] sm:$0xff] }
  0x3f   :  { %287 = vmatpush.msrb.mxu2 %v184_v35  ;;  %470 = vmatpush.msrb.mxu3 %v331_v8  ;;  %v402_v35 = vld [vmem:[%s1560_s6 + $0x328] sm:$0xff]  ;;  %v449_v8 = vld [vmem:[%s1560_s6 + $0x4a0] sm:$0xff] }
  0x40   :  { %268 = vmatpush.msrb.mxu1 %v150_v30  ;;  %489 = vmatpush.msra.mxu0 %v416_v6  ;;  %v407_v30 = vld [vmem:[%s1560_s6 + $0x350] sm:$0xff]  ;;  %v428_v6 = vld [vmem:[%s1560_s6 + $0x3f8] sm:$0xff] }
  0x41   :  { %288 = vmatpush.msrb.mxu2 %v182_v37  ;;  %471 = vmatpush.msrb.mxu3 %v326_v13  ;;  %v301_v37 = vld [vmem:[%s1560_s6] sm:$0xff]  ;;  %v323_v13 = vld [vmem:[%s1560_s6 + $0xb0] sm:$0xff] }
  0x42   :  { %490 = vmatpush.msra.mxu0 %v411_v10  ;;  %v423_v10 = vld [vmem:[%s1560_s6 + $0x3d0] sm:$0xff] }
  0x44   :  { %491 = vmatpush.msra.mxu0 %v406_v15  ;;  %v344_v15 = vld [vmem:[%s1560_s6 + $0x158] sm:$0xff] }
  0x46   :  { %492 = vmatpush.msra.mxu0 %v401_v20  ;;  %v434_v20 = vld [vmem:[%s1560_s6 + $0x428] sm:$0xff] }
  0x48   :  { %493 = vmatpush.msra.mxu0 %v396_v28  ;;  %v424_v28 = vld [vmem:[%s1560_s6 + $0x3d8] sm:$0xff] }
  0x4a   :  { %494 = vmatpush.msra.mxu0 %v391_v32  ;;  %v419_v32 = vld [vmem:[%s1560_s6 + $0x3b0] sm:$0xff] }
  0x4c   :  { %495 = vmatpush.msra.mxu0 %v386_v38  ;;  %v409_v38 = vld [vmem:[%s1560_s6 + $0x360] sm:$0xff] }
  0x4e   :  { %496 = vmatpush.msra.mxu0 %v381_v41  ;;  %v404_v41 = vld [vmem:[%s1560_s6 + $0x338] sm:$0xff] }
  0x80   :  { %v65_v17 = vpop.f32.mrf.mxu0 }
  0x81   :  { %v66_v18 = vadd.f32 %v689_v16, %v65_v17  ;;  %v417_v16 = vld [vmem:[%s1560_s6 + $0x3a0] sm:$0xff] }
  0x82   :  { %v321_v17 = vld [vmem:[%s1560_s6 + $0xa0] sm:$0xff] }
  0x83   :  { %v68_v19 = vmax.f32 %v66_v18, 0.0  ;;  %v327_v18 = vld [vmem:[%s1560_s6 + $0xd0] sm:$0xff]  ;;  %472 = vmatpush.msrb.mxu3 %v321_v17  ;;  %v318_v17 = vld [vmem:[%s1560_s6 + $0x88] sm:$0xff] }
  0x85   :  { %123 = vmatmul.f32.vlgmr.msra.gmra.mxu1 %v68_v19  ;;  %143 = vmatmul.f32.vlgmr.msra.gmra.mxu2 %v68_v19 }
  0x86   :  { %501 = vmatpush.msra.mxu1 %v377_v43  ;;  %521 = vmatpush.msra.mxu2 %v457_v49  ;;  %v458_v43 = vld [vmem:[%s1560_s6 + $0x4e8] sm:$0xff]  ;;  %v379_v49 = vld [vmem:[%s1560_s6 + $0x270] sm:$0xff] }
  0x87   :  { %473 = vmatpush.msrb.mxu3 %v316_v23  ;;  %v334_v23 = vld [vmem:[%s1560_s6 + $0x108] sm:$0xff] }
  0x88   :  { %502 = vmatpush.msra.mxu1 %v372_v45  ;;  %522 = vmatpush.msra.mxu2 %v452_v53  ;;  %v397_v45 = vld [vmem:[%s1560_s6 + $0x300] sm:$0xff]  ;;  %v374_v53 = vld [vmem:[%s1560_s6 + $0x248] sm:$0xff] }
  0x89   :  { %474 = vmatpush.msrb.mxu3 %v311_v27  ;;  %v329_v27 = vld [vmem:[%s1560_s6 + $0xe0] sm:$0xff] }
  0x8a   :  { %503 = vmatpush.msra.mxu1 %v367_v47  ;;  %523 = vmatpush.msra.mxu2 %v447_v56  ;;  %v453_v47 = vld [vmem:[%s1560_s6 + $0x4c0] sm:$0xff]  ;;  %v358_v56 = vld [vmem:[%s1560_s6 + $0x1c8] sm:$0xff] }
  0x8b   :  { %475 = vmatpush.msrb.mxu3 %v306_v31  ;;  %v324_v31 = vld [vmem:[%s1560_s6 + $0xb8] sm:$0xff] }
  0x8c   :  { %504 = vmatpush.msra.mxu1 %v362_v51  ;;  %524 = vmatpush.msra.mxu2 %v442_v58  ;;  %v448_v51 = vld [vmem:[%s1560_s6 + $0x498] sm:$0xff]  ;;  %v382_v58 = vld [vmem:[%s1560_s6 + $0x288] sm:$0xff] }
  0x8d   :  { %476 = vmatpush.msrb.mxu3 %v301_v37  ;;  %v314_v37 = vld [vmem:[%s1560_s6 + $0x68] sm:$0xff] }
  0x8e   :  { %505 = vmatpush.msra.mxu1 %v357_v55  ;;  %525 = vmatpush.msra.mxu2 %v437_v62  ;;  %v443_v55 = vld [vmem:[%s1560_s6 + $0x470] sm:$0xff] }
  0x8f   :  { %v459_v62 = vld [vmem:[%s1560_s6 + $0x4f0] sm:$0xff] }
  0x90   :  { %506 = vmatpush.msra.mxu1 %v352_v60  ;;  %526 = vmatpush.msra.mxu2 %v432_v2  ;;  %v353_v60 = vld [vmem:[%s1560_s6 + $0x1a0] sm:$0xff] }
  0x91   :  { %v433_v2 = vld [vmem:[%s1560_s6 + $0x420] sm:$0xff] }
  0x92   :  { %507 = vmatpush.msra.mxu1 %v347_v0  ;;  %527 = vmatpush.msra.mxu2 %v427_v7  ;;  %v343_v0 = vld [vmem:[%s1560_s6 + $0x150] sm:$0xff]  ;;  %v354_v7 = vld [vmem:[%s1560_s6 + $0x1a8] sm:$0xff] }
  0x94   :  { %508 = vmatpush.msra.mxu1 %v342_v4  ;;  %528 = vmatpush.msra.mxu2 %v422_v11  ;;  %v454_v4 = vld [vmem:[%s1560_s6 + $0x4c8] sm:$0xff]  ;;  %v349_v11 = vld [vmem:[%s1560_s6 + $0x180] sm:$0xff] }
  0x96   :  { %509 = vmatpush.msra.mxu1 %v337_v9  ;;  %529 = vmatpush.msra.mxu2 %v417_v16  ;;  %v328_v9 = vld [vmem:[%s1560_s6 + $0xd8] sm:$0xff]  ;;  %v439_v16 = vld [vmem:[%s1560_s6 + $0x450] sm:$0xff] }
  0x98   :  { %510 = vmatpush.msra.mxu1 %v332_v14  ;;  %530 = vmatpush.msra.mxu2 %v412_v21  ;;  %v418_v14 = vld [vmem:[%s1560_s6 + $0x3a8] sm:$0xff]  ;;  %v313_v21 = vld [vmem:[%s1560_s6 + $0x60] sm:$0xff] }
  0x9a   :  { %511 = vmatpush.msra.mxu1 %v327_v18  ;;  %531 = vmatpush.msra.mxu2 %v407_v30  ;;  %v413_v18 = vld [vmem:[%s1560_s6 + $0x380] sm:$0xff]  ;;  %v398_v30 = vld [vmem:[%s1560_s6 + $0x308] sm:$0xff] }
  0x9c   :  { %512 = vmatpush.msra.mxu1 %v322_v24  ;;  %532 = vmatpush.msra.mxu2 %v402_v35  ;;  %v429_v24 = vld [vmem:[%s1560_s6 + $0x400] sm:$0xff]  ;;  %v414_v35 = vld [vmem:[%s1560_s6 + $0x388] sm:$0xff] }
  0x9e   :  { %513 = vmatpush.msra.mxu1 %v317_v29  ;;  %533 = vmatpush.msra.mxu2 %v397_v45  ;;  %v303_v29 = vld [vmem:[%s1560_s6 + $0x10] sm:$0xff]  ;;  %v389_v45 = vld [vmem:[%s1560_s6 + $0x2c0] sm:$0xff] }
  0xa0   :  { %514 = vmatpush.msra.mxu1 %v312_v34  ;;  %534 = vmatpush.msra.mxu2 %v392_v50  ;;  %v319_v34 = vld [vmem:[%s1560_s6 + $0x90] sm:$0xff]  ;;  %v296_v50 = vstv %s1562_s7 }
  0xa2   :  { %515 = vmatpush.msra.mxu1 %v307_v42  ;;  %535 = vmatpush.msra.mxu2 %v387_v54  ;;  %v304_v42 = vld [vmem:[%s1560_s6 + $0x18] sm:$0xff] }
  0xa4   :  { %516 = vmatpush.msra.mxu1 %v302_v46  ;;  %536 = vmatpush.msra.mxu2 %v382_v58  ;;  %v384_v46 = vld [vmem:[%s1560_s6 + $0x298] sm:$0xff] }
 0x102   :  { %v124_v19 = vpop.f32.mrf.mxu1 }
 0x103   :  { %v125_v22 = vadd.f32 %v124_v19, %v103_v12  ;;  %v444_v12 = vld [vmem:[%s1560_s6 + $0x478] sm:$0xff]  ;;  %v339_v19 = vld [vmem:[%s1560_s6 + $0x130] sm:$0xff] }
 0x105   :  { %v147_v25 = vmax.f32 %v125_v22, 0.0  ;;  %v408_v22 = vld [vmem:[%s1560_s6 + $0x358] sm:$0xff] }
 0x107   :  { %229 = vmatmul.f32.vlgmr.msra.gmra.mxu3 %v147_v25  ;;  %269 = vmatmul.f32.vlgmr.msrb.gmra.mxu1 %v147_v25  ;;  %v308_v25 = vld [vmem:[%s1560_s6 + $0x38] sm:$0xff] }
 0x108   :  { %v144_v33 = vpop.f32.mrf.mxu2  ;;  %541 = vmatpush.msra.mxu3 %v378_v40  ;;  %581 = vmatpush.msrb.mxu1 %v379_v49  ;;  %v309_v40 = vld [vmem:[%s1560_s6 + $0x40] sm:$0xff] }
 0x109   :  { %v145_v36 = vadd.f32 %v144_v33, %v104_v26  ;;  %v403_v26 = vld [vmem:[%s1560_s6 + $0x330] sm:$0xff]  ;;  %v393_v33 = vld [vmem:[%s1560_s6 + $0x2e0] sm:$0xff] }
 0x10a   :  { %542 = vmatpush.msra.mxu3 %v373_v44  ;;  %582 = vmatpush.msrb.mxu1 %v374_v53  ;;  %v394_v44 = vld [vmem:[%s1560_s6 + $0x2e8] sm:$0xff] }
 0x10b   :  { %v148_v39 = vmax.f32 %v145_v36, 0.0  ;;  %v388_v36 = vld [vmem:[%s1560_s6 + $0x2b8] sm:$0xff] }
 0x10c   :  { %543 = vmatpush.msra.mxu3 %v368_v48  ;;  %583 = vmatpush.msrb.mxu1 %v369_v57  ;;  %v380_v57 = vld [vmem:[%s1560_s6 + $0x278] sm:$0xff] }
 0x10d   :  { %249 = vmatmul.f32.vlgmr.msrb.gmra.mxu0 %v148_v39  ;;  %289 = vmatmul.f32.vlgmr.msrb.gmra.mxu2 %v148_v39  ;;  %v383_v39 = vld [vmem:[%s1560_s6 + $0x290] sm:$0xff] }
 0x10e   :  { %561 = vmatpush.msrb.mxu0 %v458_v43  ;;  %544 = vmatpush.msra.mxu3 %v363_v52  ;;  %v399_v43 = vld [vmem:[%s1560_s6 + $0x310] sm:$0xff] }
 0x10f   :  { %584 = vmatpush.msrb.mxu1 %v364_v61  ;;  %601 = vmatpush.msrb.mxu2 %v459_v62  ;;  %v370_v61 = vld [vmem:[%s1560_s6 + $0x228] sm:$0xff] }
 0x110   :  { %562 = vmatpush.msrb.mxu0 %v453_v47  ;;  %545 = vmatpush.msra.mxu3 %v358_v56 }
 0x111   :  { %585 = vmatpush.msrb.mxu1 %v359_v3  ;;  %602 = vmatpush.msrb.mxu2 %v454_v4  ;;  %v355_v3 = vld [vmem:[%s1560_s6 + $0x1b0] sm:$0xff]  ;;  %v450_v4 = vld [vmem:[%s1560_s6 + $0x4a8] sm:$0xff] }
 0x112   :  { %563 = vmatpush.msrb.mxu0 %v448_v51  ;;  %546 = vmatpush.msra.mxu3 %v353_v60 }
 0x113   :  { %586 = vmatpush.msrb.mxu1 %v354_v7  ;;  %603 = vmatpush.msrb.mxu2 %v449_v8  ;;  %v345_v7 = vld [vmem:[%s1560_s6 + $0x160] sm:$0xff]  ;;  %v440_v8 = vld [vmem:[%s1560_s6 + $0x458] sm:$0xff] }
 0x114   :  { %564 = vmatpush.msrb.mxu0 %v443_v55  ;;  %547 = vmatpush.msra.mxu3 %v348_v63  ;;  %v365_v63 = vld [vmem:[%s1560_s6 + $0x200] sm:$0xff] }
 0x115   :  { %587 = vmatpush.msrb.mxu1 %v349_v11  ;;  %604 = vmatpush.msrb.mxu2 %v444_v12  ;;  %v335_v11 = vld [vmem:[%s1560_s6 + $0x110] sm:$0xff]  ;;  %v430_v12 = vld [vmem:[%s1560_s6 + $0x408] sm:$0xff] }
 0x116   :  { %565 = vmatpush.msrb.mxu0 %v438_v59  ;;  %548 = vmatpush.msra.mxu3 %v343_v0  ;;  %v375_v59 = vld [vmem:[%s1560_s6 + $0x250] sm:$0xff]  ;;  %v460_v0 = vld [vmem:[%s1560_s6 + $0x4f8] sm:$0xff] }
 0x117   :  { %588 = vmatpush.msrb.mxu1 %v344_v15  ;;  %605 = vmatpush.msrb.mxu2 %v439_v16  ;;  %v325_v15 = vld [vmem:[%s1560_s6 + $0xc0] sm:$0xff]  ;;  %v420_v16 = vld [vmem:[%s1560_s6 + $0x3b8] sm:$0xff] }
 0x118   :  { %549 = vmatpush.msra.mxu3 %v338_v1  ;;  %566 = vmatpush.msrb.mxu0 %v433_v2  ;;  %v360_v1 = vld [vmem:[%s1560_s6 + $0x1d8] sm:$0xff]  ;;  %v455_v2 = vld [vmem:[%s1560_s6 + $0x4d0] sm:$0xff] }
 0x119   :  { %589 = vmatpush.msrb.mxu1 %v339_v19  ;;  %606 = vmatpush.msrb.mxu2 %v434_v20  ;;  %v315_v19 = vld [vmem:[%s1560_s6 + $0x70] sm:$0xff]  ;;  %v410_v20 = vld [vmem:[%s1560_s6 + $0x368] sm:$0xff] }
 0x11a   :  { %550 = vmatpush.msra.mxu3 %v333_v5  ;;  %567 = vmatpush.msrb.mxu0 %v428_v6  ;;  %v350_v5 = vld [vmem:[%s1560_s6 + $0x188] sm:$0xff]  ;;  %v445_v6 = vld [vmem:[%s1560_s6 + $0x480] sm:$0xff] }
 0x11b   :  { %590 = vmatpush.msrb.mxu1 %v334_v23  ;;  %607 = vmatpush.msrb.mxu2 %v429_v24  ;;  %v305_v23 = vld [vmem:[%s1560_s6 + $0x20] sm:$0xff]  ;;  %v400_v24 = vld [vmem:[%s1560_s6 + $0x318] sm:$0xff] }
 0x11c   :  { %551 = vmatpush.msra.mxu3 %v328_v9  ;;  %568 = vmatpush.msrb.mxu0 %v423_v10  ;;  %v340_v9 = vld [vmem:[%s1560_s6 + $0x138] sm:$0xff]  ;;  %v435_v10 = vld [vmem:[%s1560_s6 + $0x430] sm:$0xff] }
 0x11d   :  { %591 = vmatpush.msrb.mxu1 %v329_v27  ;;  %608 = vmatpush.msrb.mxu2 %v424_v28  ;;  %v385_v27 = vld [vmem:[%s1560_s6 + $0x2a0] sm:$0xff] }
 0x11e   :  { %552 = vmatpush.msra.mxu3 %v323_v13  ;;  %569 = vmatpush.msrb.mxu0 %v418_v14  ;;  %v330_v13 = vld [vmem:[%s1560_s6 + $0xe8] sm:$0xff]  ;;  %v425_v14 = vld [vmem:[%s1560_s6 + $0x3e0] sm:$0xff] }
 0x11f   :  { %592 = vmatpush.msrb.mxu1 %v324_v31  ;;  %609 = vmatpush.msrb.mxu2 %v419_v32  ;;  %v667_v31 = vstv %s1563_s8 }
 0x120   :  { %553 = vmatpush.msra.mxu3 %v318_v17  ;;  %570 = vmatpush.msrb.mxu0 %v413_v18  ;;  %v320_v17 = vld [vmem:[%s1560_s6 + $0x98] sm:$0xff]  ;;  %v415_v18 = vld [vmem:[%s1560_s6 + $0x390] sm:$0xff] }
 0x121   :  { %593 = vmatpush.msrb.mxu1 %v319_v34  ;;  %610 = vmatpush.msrb.mxu2 %v414_v35 }
 0x122   :  { %554 = vmatpush.msra.mxu3 %v313_v21  ;;  %571 = vmatpush.msrb.mxu0 %v408_v22  ;;  %v310_v21 = vld [vmem:[%s1560_s6 + $0x48] sm:$0xff]  ;;  %v405_v22 = vld [vmem:[%s1560_s6 + $0x340] sm:$0xff] }
 0x123   :  { %594 = vmatpush.msrb.mxu1 %v314_v37  ;;  %611 = vmatpush.msrb.mxu2 %v409_v38 }
 0x124   :  { %555 = vmatpush.msra.mxu3 %v308_v25  ;;  %572 = vmatpush.msrb.mxu0 %v403_v26  ;;  %v395_v25 = vld [vmem:[%s1560_s6 + $0x2f0] sm:$0xff]  ;;  %v390_v26 = vld [vmem:[%s1560_s6 + $0x2c8] sm:$0xff] }
 0x125   :  { %595 = vmatpush.msrb.mxu1 %v309_v40  ;;  %612 = vmatpush.msrb.mxu2 %v404_v41 }
 0x126   :  { %556 = vmatpush.msra.mxu3 %v303_v29  ;;  %573 = vmatpush.msrb.mxu0 %v398_v30 }
 0x127   :  { %596 = vmatpush.msrb.mxu1 %v304_v42  ;;  %613 = vmatpush.msrb.mxu2 %v399_v43 }
 0x128   :  { %574 = vmatpush.msrb.mxu0 %v393_v33 }
 0x129   :  { %614 = vmatpush.msrb.mxu2 %v394_v44 }
 0x12a   :  { %575 = vmatpush.msrb.mxu0 %v388_v36 }
 0x12b   :  { %615 = vmatpush.msrb.mxu2 %v389_v45 }
 0x12c   :  { %576 = vmatpush.msrb.mxu0 %v383_v39 }
 0x12d   :  { %616 = vmatpush.msrb.mxu2 %v384_v46 }
 0x184   :  { %v270_v53 = vpop.f32.mrf.mxu1 }
 0x18a   :  { %v230_v47 = vpop.f32.mrf.mxu3  ;;  %v250_v48 = vpop.f32.mrf.mxu0 }
 0x18b   :  { %v251_v49 = vadd.f32 %v250_v48, %v230_v47 }
 0x18d   :  { %v293_v51 = vmax.f32 %v251_v49, 0.0 }
 0x18f   :  { %v297_v52 = vmul.f32 %v296_v50, %v293_v51 }
 0x190   :  { %v290_v54 = vpop.f32.mrf.mxu2 }
 0x191   :  { %v1427_v55 = vmax.f32 %v297_v52, 0.0  ;;  %v291_v56 = vadd.f32 %v290_v54, %v270_v53 }
 0x193   :  { %v294_v58 = vmax.f32 %v291_v56, 0.0  ;;  %477 = vmatmul.f32.vlgmr.msrb.gmra.mxu3 %v1427_v55  ;;  %517 = vmatmul.f32.vlgmr.msra.gmra.mxu1 %v1427_v55 }
 0x194   :  { %621 = vmatpush.msrb.mxu3 %v380_v57 }
 0x195   :  { %v298_v60 = vmul.f32 %v296_v50, %v294_v58 }
 0x196   :  { %622 = vmatpush.msrb.mxu3 %v375_v59 }
 0x197   :  { %v1440_v62 = vmax.f32 %v298_v60, 0.0 }
 0x198   :  { %623 = vmatpush.msrb.mxu3 %v370_v61 }
 0x199   :  { %497 = vmatmul.f32.vlgmr.msra.gmra.mxu0 %v1440_v62  ;;  %537 = vmatmul.f32.vlgmr.msra.gmra.mxu2 %v1440_v62 }
 0x19a   :  { %624 = vmatpush.msrb.mxu3 %v365_v63  ;;  %641 = vmatpush.msra.mxu0 %v460_v0 }
 0x19b   :  { %557 = vmatmul.f32.vlgmr.msra.gmra.mxu3 %v1427_v55  ;;  %597 = vmatmul.f32.vlgmr.msrb.gmra.mxu1 %v1427_v55 }
 0x19c   :  { %625 = vmatpush.msrb.mxu3 %v360_v1  ;;  %642 = vmatpush.msra.mxu0 %v455_v2 }
 0x19e   :  { %626 = vmatpush.msrb.mxu3 %v355_v3  ;;  %643 = vmatpush.msra.mxu0 %v450_v4 }
 0x1a0   :  { %627 = vmatpush.msrb.mxu3 %v350_v5  ;;  %644 = vmatpush.msra.mxu0 %v445_v6 }
 0x1a1   :  { %577 = vmatmul.f32.vlgmr.msrb.gmra.mxu0 %v1440_v62  ;;  %617 = vmatmul.f32.vlgmr.msrb.gmra.mxu2 %v1440_v62 }
 0x1a2   :  { %628 = vmatpush.msrb.mxu3 %v345_v7  ;;  %645 = vmatpush.msra.mxu0 %v440_v8 }
 0x1a4   :  { %629 = vmatpush.msrb.mxu3 %v340_v9  ;;  %646 = vmatpush.msra.mxu0 %v435_v10 }
 0x1a6   :  { %630 = vmatpush.msrb.mxu3 %v335_v11  ;;  %647 = vmatpush.msra.mxu0 %v430_v12 }
 0x1a8   :  { %631 = vmatpush.msrb.mxu3 %v330_v13  ;;  %648 = vmatpush.msra.mxu0 %v425_v14 }
 0x1aa   :  { %632 = vmatpush.msrb.mxu3 %v325_v15  ;;  %649 = vmatpush.msra.mxu0 %v420_v16 }
 0x1ac   :  { %633 = vmatpush.msrb.mxu3 %v320_v17  ;;  %650 = vmatpush.msra.mxu0 %v415_v18 }
 0x1ae   :  { %634 = vmatpush.msrb.mxu3 %v315_v19  ;;  %651 = vmatpush.msra.mxu0 %v410_v20 }
 0x1b0   :  { %635 = vmatpush.msrb.mxu3 %v310_v21  ;;  %652 = vmatpush.msra.mxu0 %v405_v22 }
 0x1b2   :  { %636 = vmatpush.msrb.mxu3 %v305_v23  ;;  %653 = vmatpush.msra.mxu0 %v400_v24 }
 0x1b3   :  { %637 = vmatmul.f32.vlgmr.msrb.gmra.mxu3 %v1427_v55 }
 0x1b4   :  { %654 = vmatpush.msra.mxu0 %v395_v25 }
 0x1b6   :  { %655 = vmatpush.msra.mxu0 %v390_v26 }
 0x1b8   :  { %656 = vmatpush.msra.mxu0 %v385_v27 }
 0x1b9   :  { %657 = vmatmul.f32.vlgmr.msra.gmra.mxu0 %v1440_v62 }
 0x210   :  { %v518_v33 = vpop.f32.mrf.mxu1 }
 0x216   :  { %v478_v28 = vpop.f32.mrf.mxu3  ;;  %v498_v29 = vpop.f32.mrf.mxu0 }
 0x217   :  { %v499_v30 = vadd.f32 %v498_v29, %v478_v28 }
 0x218   :  { %v598_v46 = vpop.f32.mrf.mxu1 }
 0x219   :  { %v661_v32 = vmax.f32 %v499_v30, 0.0 }
 0x21b   :  { %v668_v34 = vmul.f32 %v667_v31, %v661_v32 }
 0x21c   :  { %v538_v35 = vpop.f32.mrf.mxu2 }
 0x21d   :  { %v673_v36 = vmax.f32 %v668_v34, 0.0  ;;  %v539_v37 = vadd.f32 %v538_v35, %v518_v33 }
 0x21e   :  { %v558_v38 = vpop.f32.mrf.mxu3  ;;  %v578_v39 = vpop.f32.mrf.mxu0 }
 0x21f   :  { %678 = vst [vmem:[%s1564_s9] sm:$0xff] %v673_v36  ;;  %v662_v40 = vmax.f32 %v539_v37, 0.0  ;;  %v579_v41 = vadd.f32 %v578_v39, %v558_v38 }
 0x221   :  { %v669_v42 = vmul.f32 %v667_v31, %v662_v40  ;;  %v663_v43 = vmax.f32 %v579_v41, 0.0 }
 0x223   :  { %v674_v44 = vmax.f32 %v669_v42, 0.0  ;;  %v670_v45 = vmul.f32 %v667_v31, %v663_v43 }
 0x224   :  { %v618_v47 = vpop.f32.mrf.mxu2 }
 0x225   :  { %679 = vst [vmem:[%s1564_s9 + $0x8] sm:$0xff] %v674_v44  ;;  %v675_v48 = vmax.f32 %v670_v45, 0.0  ;;  %v619_v49 = vadd.f32 %v618_v47, %v598_v46 }
 0x227   :  { %680 = vst [vmem:[%s1564_s9 + $0x10] sm:$0xff] %v675_v48  ;;  %v664_v50 = vmax.f32 %v619_v49, 0.0 }
 0x229   :  { %v671_v51 = vmul.f32 %v667_v31, %v664_v50 }
 0x22b   :  { %v676_v52 = vmax.f32 %v671_v51, 0.0 }
 0x22d   :  { %681 = vst [vmem:[%s1564_s9 + $0x18] sm:$0xff] %v676_v52 }
 0x236   :  { %v638_v53 = vpop.f32.mrf.mxu3  ;;  %v658_v54 = vpop.f32.mrf.mxu0 }
 0x237   :  { %v659_v55 = vadd.f32 %v658_v54, %v638_v53 }
 0x239   :  { %v665_v56 = vmax.f32 %v659_v55, 0.0 }
 0x23b   :  { %v672_v57 = vmul.f32 %v667_v31, %v665_v56 }
 0x23d   :  { %v677_v58 = vmax.f32 %v672_v57, 0.0 }
 0x23f   :  { %682 = vst [vmem:[%s1564_s9 + $0x20] sm:$0xff] %v677_v58 }

</bundles_post_ra>
